<compile_context>
chip_gen: v5e
topology: v5e:2x2
jax: 0.10.0
libtpu: 0.0.40
codegen_flags: <defaults>
</compile_context>

<pallas_src>
import functools
import math

import jax
import jax.numpy as jnp
from jax.experimental import pallas as pl
from jax.experimental.pallas import tpu as pltpu


def _round_up(x: int, m: int) -> int:
    return ((x + m - 1) // m) * m


def _cdiv(a: int, b: int) -> int:
    return -(-a // b)


# ------------------------------- kernel body --------------------------------


def _mlp_fused_kernel(x_ref, *refs, num_layers: int):
    """Whole-MLP body. refs = (w0, b0, w1, b1, ..., o_ref)."""
    out_ref = refs[-1]
    wb = refs[:-1]
    h = x_ref[...].astype(jnp.float32)
    for l in range(num_layers):                       # static layer count
        w = wb[2 * l][...]                            # (K, N_pad) bf16, VMEM-resident
        b = wb[2 * l + 1][...].astype(jnp.float32)    # (1, N_pad) f32
        # bf16 operands feed the MXU at full rate; f32 accumulation + epilogue.
        h = jnp.dot(h.astype(w.dtype), w, preferred_element_type=jnp.float32) + b
        if l < num_layers - 1:
            h = jnp.maximum(h, 0.0)                   # ReLU on f32
    out_ref[...] = h.astype(out_ref.dtype)


# --------------------------- one-time param prep ----------------------------


def prepare_mlp_params(params, compute_dtype=jnp.bfloat16):
    """Pad once at init (hoisted out of the per-call path).

    Feature dims are zero-padded to multiples of 128 (lane-dense), except the
    very first K which is kept equal to dim_in so `x` never needs a feature
    copy.  Weights are stored in `compute_dtype` (bf16) for the MXU; biases
    stay f32 for the f32 epilogue.  Zero padding keeps the math exact
    (ReLU(0) = 0, padded rows/cols contribute nothing).
    """
    prepared = []
    for l, (w, b) in enumerate(params):
        k, n = w.shape
        kp = k if l == 0 else _round_up(k, 128)
        np_ = _round_up(n, 128)
        w_p = jnp.zeros((kp, np_), compute_dtype).at[:k, :n].set(
            w.astype(compute_dtype))
        b_p = jnp.zeros((1, np_), jnp.float32).at[0, :n].set(
            b.astype(jnp.float32))
        prepared.append((w_p, b_p))
    dim_out = params[-1][0].shape[1]
    return prepared, dim_out


def _vmem_capacity_bytes() -> int:
    try:
        return int(pltpu.get_tpu_info().vmem_capacity_bytes)
    except Exception:
        return 64 * 1024 * 1024  # conservative: v7x per-TensorCore


# --------------------------------- forward ----------------------------------


def mlp_forward_fused(prepared, dim_out, x, *, row_tile=None):
    """Run the full MLP in one pallas_call.

    prepared: output of prepare_mlp_params.
    x: (M, dim_in) float32.
    """
    M, dim_in = x.shape
    num_layers = len(prepared)
    assert prepared[0][0].shape[0] == dim_in, "x feature dim mismatch"
    out_pad = prepared[-1][0].shape[1]
    max_feat = max([dim_in] + [w.shape[1] for w, _ in prepared])

    capacity = _vmem_capacity_bytes()
    budget = int(0.75 * capacity)
    if row_tile is None:
        # Bigger tiles amortize the ~0.35us grid-step overhead on 128 MiB
        # parts (v5e/v6e); smaller default keeps v7x's 64 MiB/TC comfortable.
        row_tile = 512 if capacity >= (96 << 20) else 256

    def est(tm, single_buffer_weights=True):
        wmul = 1 if single_buffer_weights else 2
        resident = wmul * sum(
            w.size * w.dtype.itemsize + b.size * b.dtype.itemsize
            for w, b in prepared)
        streamed = 2 * tm * dim_in * 4 + 2 * tm * out_pad * 4  # x/out, dbl-buf
        temps = tm * max_feat * (3 * 4 + 2)  # live f32 h copies + bf16 cast
        return resident + streamed + temps

    if est(8) > budget:
        # TODO(synk): N/K-tile weights (grid axes + VMEM f32 accumulator) for
        # hidden dims whose padded weight exceeds ~1/4 of usable VMEM.
        raise ValueError("resident weights exceed the VMEM budget; "
                         "K/N weight tiling is required for this size")

    # ---- row tiling: bound pad waste and VMEM pressure ---------------------
    rt = min(row_tile, _round_up(M, 8))
    while rt > 8 and est(rt) > budget:
        rt = max(8, _round_up(rt // 2, 8))

    n_tiles = _cdiv(M, rt)
    if n_tiles < 2 and M > 8:
        n_tiles = 2                      # give both v7x TensorCores a tile
    tm = _round_up(_cdiv(M, n_tiles), 8)
    m_pad = n_tiles * tm

    vmem_limit = int(min(budget, max(2 * est(tm) + (4 << 20), 32 << 20)))

    # Pad rows only when required; feature dim stays full-width (block == dim).
    if m_pad == M:
        x_p = x
    else:
        x_p = jnp.zeros((m_pad, dim_in), x.dtype).at[:M].set(x)

    flat_wb = [a for wb in prepared for a in wb]
    kernel = functools.partial(_mlp_fused_kernel, num_layers=num_layers)

    def call(single_buffer_weights):
        wb_kwargs = ({"pipeline_mode": pl.Buffered(1)}
                     if single_buffer_weights else {})
        in_specs = [pl.BlockSpec((tm, dim_in), lambda i: (i, 0))]
        for w_p, b_p in prepared:
            kp, np_ = w_p.shape
            in_specs.append(
                pl.BlockSpec((kp, np_), lambda i: (0, 0), **wb_kwargs))
            in_specs.append(
                pl.BlockSpec((1, np_), lambda i: (0, 0), **wb_kwargs))
        return pl.pallas_call(
            kernel,
            out_shape=jax.ShapeDtypeStruct((m_pad, out_pad), x.dtype),
            grid_spec=pltpu.PrefetchScalarGridSpec(
                num_scalar_prefetch=0,
                grid=(n_tiles,),
                in_specs=in_specs,
                out_specs=pl.BlockSpec((tm, out_pad), lambda i: (i, 0)),
            ),
            compiler_params=pltpu.CompilerParams(
                dimension_semantics=("parallel",),  # row tiles shard across TCs
                vmem_limit_bytes=vmem_limit,
            ),
        )(x_p, *flat_wb)

    try:
        out_p = call(True)               # single-buffered resident weights
    except Exception:
        out_p = call(False)              # fallback: default double-buffering

    return out_p[:M, :dim_out]


# ----------------------------- params / reference ---------------------------


def xavier_uniform(key, fan_in, fan_out, dtype=jnp.float32):
    # Matches torch.nn.init.xavier_uniform_ (gain=1), built directly as the
    # transposed (in, out) matrix (bound is symmetric).
    bound = math.sqrt(6.0 / (fan_in + fan_out))
    return jax.random.uniform(
        key, (fan_in, fan_out), dtype=dtype, minval=-bound, maxval=bound)


def init_mlp_params(key, dim_in, dim_out, nb_hidden, dim_hidden):
    keys = jax.random.split(key, nb_hidden + 1)
    params = [(xavier_uniform(keys[0], dim_in, dim_hidden),
               jnp.zeros((dim_hidden,), jnp.float32))]
    for h in range(nb_hidden - 1):
        params.append((xavier_uniform(keys[1 + h], dim_hidden, dim_hidden),
                       jnp.zeros((dim_hidden,), jnp.float32)))
    params.append((xavier_uniform(keys[nb_hidden], dim_hidden, dim_out),
                   jnp.zeros((dim_out,), jnp.float32)))
    return params


def mlp_reference(params, x):
    h = x
    for (w, b) in params[:-1]:
        h = jnp.maximum(h @ w + b, 0.0)
    w, b = params[-1]
    return h @ w + b


if __name__ == "__main__":
    dim_in, dim_out, nb_hidden, dim_hidden = 32, 16, 3, 64
    batch = 8

    key = jax.random.PRNGKey(0)
    k_params, k_x = jax.random.split(key)

    params = init_mlp_params(k_params, dim_in, dim_out, nb_hidden, dim_hidden)
    x = jax.random.normal(k_x, (batch, dim_in), dtype=jnp.float32)

    prepared, dim_out_real = prepare_mlp_params(params)   # pad/cast once
    out = mlp_forward_fused(prepared, dim_out_real, x)
    jax.block_until_ready(out)

    ref = mlp_reference(params, x)                         # full-f32 reference
    assert out.shape == (batch, dim_out), out.shape
    err = float(jnp.max(jnp.abs(out - ref)))
    # Tolerance sized for bf16 MXU operands with f32 accumulation.
    assert err < 5e-2, err

    print("KERNEL_OK")
</pallas_src>

<mosaic_0001>
module attributes {stable_mosaic.version = 11 : i64} {
  func.func @_mlp_fused_kernel(%arg0: i32, %arg1: memref<8x32xf32, #tpu.memory_space<vmem>>, %arg2: memref<32x128xbf16, #tpu.memory_space<vmem>>, %arg3: memref<1x128xf32, #tpu.memory_space<vmem>>, %arg4: memref<128x128xbf16, #tpu.memory_space<vmem>>, %arg5: memref<1x128xf32, #tpu.memory_space<vmem>>, %arg6: memref<128x128xbf16, #tpu.memory_space<vmem>>, %arg7: memref<1x128xf32, #tpu.memory_space<vmem>>, %arg8: memref<128x128xbf16, #tpu.memory_space<vmem>>, %arg9: memref<1x128xf32, #tpu.memory_space<vmem>>, %arg10: memref<8x128xf32, #tpu.memory_space<vmem>>) attributes {dimension_semantics = [#tpu.dimension_semantics<parallel>], iteration_bounds = array<i64: 1>, scalar_prefetch = 0 : i64, scratch_operands = 0 : i64, tpu.core_type = #tpu.core_type<tc>, window_params = [{transform_indices = @transform_0, window_bounds = array<i64: 8, 32>}, {pipeline_mode = #tpu.pipeline_mode<synchronous>, transform_indices = @transform_1, window_bounds = array<i64: 32, 128>}, {pipeline_mode = #tpu.pipeline_mode<synchronous>, transform_indices = @transform_2, window_bounds = array<i64: 1, 128>}, {pipeline_mode = #tpu.pipeline_mode<synchronous>, transform_indices = @transform_3, window_bounds = array<i64: 128, 128>}, {pipeline_mode = #tpu.pipeline_mode<synchronous>, transform_indices = @transform_4, window_bounds = array<i64: 1, 128>}, {pipeline_mode = #tpu.pipeline_mode<synchronous>, transform_indices = @transform_5, window_bounds = array<i64: 128, 128>}, {pipeline_mode = #tpu.pipeline_mode<synchronous>, transform_indices = @transform_6, window_bounds = array<i64: 1, 128>}, {pipeline_mode = #tpu.pipeline_mode<synchronous>, transform_indices = @transform_7, window_bounds = array<i64: 128, 128>}, {pipeline_mode = #tpu.pipeline_mode<synchronous>, transform_indices = @transform_8, window_bounds = array<i64: 1, 128>}, {transform_indices = @transform_9, window_bounds = array<i64: 8, 128>}]} {
    %c0 = arith.constant 0 : index
    %c0_0 = arith.constant 0 : index
    %0 = vector.load %arg1[%c0, %c0_0] : memref<8x32xf32, #tpu.memory_space<vmem>>, vector<8x32xf32>
    %c0_1 = arith.constant 0 : index
    %c0_2 = arith.constant 0 : index
    %1 = vector.load %arg2[%c0_1, %c0_2] : memref<32x128xbf16, #tpu.memory_space<vmem>>, vector<32x128xbf16>
    %c0_3 = arith.constant 0 : index
    %c0_4 = arith.constant 0 : index
    %2 = vector.load %arg3[%c0_3, %c0_4] : memref<1x128xf32, #tpu.memory_space<vmem>>, vector<1x128xf32>
    %3 = arith.truncf %0 : vector<8x32xf32> to vector<8x32xbf16>
    %cst = arith.constant dense<0.000000e+00> : vector<8x128xf32>
    %4 = tpu.matmul %3, %1, %cst {dimension_numbers = #tpu.dot_dimension_numbers<[1], [0], [0], [1], [0, 0, 1, 1], [], []>} : vector<8x32xbf16>, vector<32x128xbf16>, vector<8x128xf32> -> vector<8x128xf32>
    %5 = vector.broadcast %2 : vector<1x128xf32> to vector<8x128xf32>
    %6 = arith.addf %4, %5 : vector<8x128xf32>
    %cst_5 = arith.constant 0.000000e+00 : f32
    %7 = vector.broadcast %cst_5 : f32 to vector<8x128xf32>
    %8 = arith.maximumf %6, %7 : vector<8x128xf32>
    %c0_6 = arith.constant 0 : index
    %c0_7 = arith.constant 0 : index
    %9 = vector.load %arg4[%c0_6, %c0_7] : memref<128x128xbf16, #tpu.memory_space<vmem>>, vector<128x128xbf16>
    %c0_8 = arith.constant 0 : index
    %c0_9 = arith.constant 0 : index
    %10 = vector.load %arg5[%c0_8, %c0_9] : memref<1x128xf32, #tpu.memory_space<vmem>>, vector<1x128xf32>
    %11 = arith.truncf %8 : vector<8x128xf32> to vector<8x128xbf16>
    %cst_10 = arith.constant dense<0.000000e+00> : vector<8x128xf32>
    %12 = tpu.matmul %11, %9, %cst_10 {dimension_numbers = #tpu.dot_dimension_numbers<[1], [0], [0], [1], [0, 0, 1, 1], [], []>} : vector<8x128xbf16>, vector<128x128xbf16>, vector<8x128xf32> -> vector<8x128xf32>
    %13 = vector.broadcast %10 : vector<1x128xf32> to vector<8x128xf32>
    %14 = arith.addf %12, %13 : vector<8x128xf32>
    %cst_11 = arith.constant 0.000000e+00 : f32
    %15 = vector.broadcast %cst_11 : f32 to vector<8x128xf32>
    %16 = arith.maximumf %14, %15 : vector<8x128xf32>
    %c0_12 = arith.constant 0 : index
    %c0_13 = arith.constant 0 : index
    %17 = vector.load %arg6[%c0_12, %c0_13] : memref<128x128xbf16, #tpu.memory_space<vmem>>, vector<128x128xbf16>
    %c0_14 = arith.constant 0 : index
    %c0_15 = arith.constant 0 : index
    %18 = vector.load %arg7[%c0_14, %c0_15] : memref<1x128xf32, #tpu.memory_space<vmem>>, vector<1x128xf32>
    %19 = arith.truncf %16 : vector<8x128xf32> to vector<8x128xbf16>
    %cst_16 = arith.constant dense<0.000000e+00> : vector<8x128xf32>
    %20 = tpu.matmul %19, %17, %cst_16 {dimension_numbers = #tpu.dot_dimension_numbers<[1], [0], [0], [1], [0, 0, 1, 1], [], []>} : vector<8x128xbf16>, vector<128x128xbf16>, vector<8x128xf32> -> vector<8x128xf32>
    %21 = vector.broadcast %18 : vector<1x128xf32> to vector<8x128xf32>
    %22 = arith.addf %20, %21 : vector<8x128xf32>
    %cst_17 = arith.constant 0.000000e+00 : f32
    %23 = vector.broadcast %cst_17 : f32 to vector<8x128xf32>
    %24 = arith.maximumf %22, %23 : vector<8x128xf32>
    %c0_18 = arith.constant 0 : index
    %c0_19 = arith.constant 0 : index
    %25 = vector.load %arg8[%c0_18, %c0_19] : memref<128x128xbf16, #tpu.memory_space<vmem>>, vector<128x128xbf16>
    %c0_20 = arith.constant 0 : index
    %c0_21 = arith.constant 0 : index
    %26 = vector.load %arg9[%c0_20, %c0_21] : memref<1x128xf32, #tpu.memory_space<vmem>>, vector<1x128xf32>
    %27 = arith.truncf %24 : vector<8x128xf32> to vector<8x128xbf16>
    %cst_22 = arith.constant dense<0.000000e+00> : vector<8x128xf32>
    %28 = tpu.matmul %27, %25, %cst_22 {dimension_numbers = #tpu.dot_dimension_numbers<[1], [0], [0], [1], [0, 0, 1, 1], [], []>} : vector<8x128xbf16>, vector<128x128xbf16>, vector<8x128xf32> -> vector<8x128xf32>
    %29 = vector.broadcast %26 : vector<1x128xf32> to vector<8x128xf32>
    %30 = arith.addf %28, %29 : vector<8x128xf32>
    %c0_23 = arith.constant 0 : index
    %c0_24 = arith.constant 0 : index
    %31 = vector.load %arg10[%c0_23, %c0_24] : memref<8x128xf32, #tpu.memory_space<vmem>>, vector<8x128xf32>
    tpu.vector_store %arg10[%c0_23, %c0_24], %30 {strides = array<i32>} : memref<8x128xf32, #tpu.memory_space<vmem>>, vector<8x128xf32>,
    return
  }
  func.func @transform_0(%arg0: i32) -> (i32, i32) {
    %c0_i32 = arith.constant 0 : i32
    %c0_i32_0 = arith.constant 0 : i32
    return %arg0, %c0_i32 : i32, i32
  }
  func.func @transform_1(%arg0: i32) -> (i32, i32) {
    %c0_i32 = arith.constant 0 : i32
    %c0_i32_0 = arith.constant 0 : i32
    %c0_i32_1 = arith.constant 0 : i32
    return %c0_i32, %c0_i32_0 : i32, i32
  }
  func.func @transform_2(%arg0: i32) -> (i32, i32) {
    %c0_i32 = arith.constant 0 : i32
    %c0_i32_0 = arith.constant 0 : i32
    %c0_i32_1 = arith.constant 0 : i32
    return %c0_i32, %c0_i32_0 : i32, i32
  }
  func.func @transform_3(%arg0: i32) -> (i32, i32) {
    %c0_i32 = arith.constant 0 : i32
    %c0_i32_0 = arith.constant 0 : i32
    %c0_i32_1 = arith.constant 0 : i32
    return %c0_i32, %c0_i32_0 : i32, i32
  }
  func.func @transform_4(%arg0: i32) -> (i32, i32) {
    %c0_i32 = arith.constant 0 : i32
    %c0_i32_0 = arith.constant 0 : i32
    %c0_i32_1 = arith.constant 0 : i32
    return %c0_i32, %c0_i32_0 : i32, i32
  }
  func.func @transform_5(%arg0: i32) -> (i32, i32) {
    %c0_i32 = arith.constant 0 : i32
    %c0_i32_0 = arith.constant 0 : i32
    %c0_i32_1 = arith.constant 0 : i32
    return %c0_i32, %c0_i32_0 : i32, i32
  }
  func.func @transform_6(%arg0: i32) -> (i32, i32) {
    %c0_i32 = arith.constant 0 : i32
    %c0_i32_0 = arith.constant 0 : i32
    %c0_i32_1 = arith.constant 0 : i32
    return %c0_i32, %c0_i32_0 : i32, i32
  }
  func.func @transform_7(%arg0: i32) -> (i32, i32) {
    %c0_i32 = arith.constant 0 : i32
    %c0_i32_0 = arith.constant 0 : i32
    %c0_i32_1 = arith.constant 0 : i32
    return %c0_i32, %c0_i32_0 : i32, i32
  }
  func.func @transform_8(%arg0: i32) -> (i32, i32) {
    %c0_i32 = arith.constant 0 : i32
    %c0_i32_0 = arith.constant 0 : i32
    %c0_i32_1 = arith.constant 0 : i32
    return %c0_i32, %c0_i32_0 : i32, i32
  }
  func.func @transform_9(%arg0: i32) -> (i32, i32) {
    %c0_i32 = arith.constant 0 : i32
    %c0_i32_0 = arith.constant 0 : i32
    return %arg0, %c0_i32 : i32, i32
  }
}

module attributes {stable_mosaic.version = 11 : i64} {
  func.func @_mlp_fused_kernel(%arg0: i32, %arg1: memref<8x32xf32, #tpu.memory_space<vmem>>, %arg2: memref<32x128xbf16, #tpu.memory_space<vmem>>, %arg3: memref<1x128xf32, #tpu.memory_space<vmem>>, %arg4: memref<128x128xbf16, #tpu.memory_space<vmem>>, %arg5: memref<1x128xf32, #tpu.memory_space<vmem>>, %arg6: memref<128x128xbf16, #tpu.memory_space<vmem>>, %arg7: memref<1x128xf32, #tpu.memory_space<vmem>>, %arg8: memref<128x128xbf16, #tpu.memory_space<vmem>>, %arg9: memref<1x128xf32, #tpu.memory_space<vmem>>, %arg10: memref<8x128xf32, #tpu.memory_space<vmem>>) attributes {dimension_semantics = [#tpu.dimension_semantics<parallel>], iteration_bounds = array<i64: 1>, scalar_prefetch = 0 : i64, scratch_operands = 0 : i64, tpu.core_type = #tpu.core_type<tc>, window_params = [{transform_indices = @transform_0, window_bounds = array<i64: 8, 32>}, {pipeline_mode = #tpu.pipeline_mode<synchronous>, transform_indices = @transform_1, window_bounds = array<i64: 32, 128>}, {pipeline_mode = #tpu.pipeline_mode<synchronous>, transform_indices = @transform_2, window_bounds = array<i64: 1, 128>}, {pipeline_mode = #tpu.pipeline_mode<synchronous>, transform_indices = @transform_3, window_bounds = array<i64: 128, 128>}, {pipeline_mode = #tpu.pipeline_mode<synchronous>, transform_indices = @transform_4, window_bounds = array<i64: 1, 128>}, {pipeline_mode = #tpu.pipeline_mode<synchronous>, transform_indices = @transform_5, window_bounds = array<i64: 128, 128>}, {pipeline_mode = #tpu.pipeline_mode<synchronous>, transform_indices = @transform_6, window_bounds = array<i64: 1, 128>}, {pipeline_mode = #tpu.pipeline_mode<synchronous>, transform_indices = @transform_7, window_bounds = array<i64: 128, 128>}, {pipeline_mode = #tpu.pipeline_mode<synchronous>, transform_indices = @transform_8, window_bounds = array<i64: 1, 128>}, {transform_indices = @transform_9, window_bounds = array<i64: 8, 128>}]} {
    %c0 = arith.constant 0 : index
    %c0_0 = arith.constant 0 : index
    %0 = vector.load %arg1[%c0, %c0_0] : memref<8x32xf32, #tpu.memory_space<vmem>>, vector<8x32xf32>
    %c0_1 = arith.constant 0 : index
    %c0_2 = arith.constant 0 : index
    %1 = vector.load %arg2[%c0_1, %c0_2] : memref<32x128xbf16, #tpu.memory_space<vmem>>, vector<32x128xbf16>
    %c0_3 = arith.constant 0 : index
    %c0_4 = arith.constant 0 : index
    %2 = vector.load %arg3[%c0_3, %c0_4] : memref<1x128xf32, #tpu.memory_space<vmem>>, vector<1x128xf32>
    %3 = arith.truncf %0 : vector<8x32xf32> to vector<8x32xbf16>
    %cst = arith.constant dense<0.000000e+00> : vector<8x128xf32>
    %4 = tpu.matmul %3, %1, %cst {dimension_numbers = #tpu.dot_dimension_numbers<[1], [0], [0], [1], [0, 0, 1, 1], [], []>} : vector<8x32xbf16>, vector<32x128xbf16>, vector<8x128xf32> -> vector<8x128xf32>
    %5 = vector.broadcast %2 : vector<1x128xf32> to vector<8x128xf32>
    %6 = arith.addf %4, %5 : vector<8x128xf32>
    %cst_5 = arith.constant 0.000000e+00 : f32
    %7 = vector.broadcast %cst_5 : f32 to vector<8x128xf32>
    %8 = arith.maximumf %6, %7 : vector<8x128xf32>
    %c0_6 = arith.constant 0 : index
    %c0_7 = arith.constant 0 : index
    %9 = vector.load %arg4[%c0_6, %c0_7] : memref<128x128xbf16, #tpu.memory_space<vmem>>, vector<128x128xbf16>
    %c0_8 = arith.constant 0 : index
    %c0_9 = arith.constant 0 : index
    %10 = vector.load %arg5[%c0_8, %c0_9] : memref<1x128xf32, #tpu.memory_space<vmem>>, vector<1x128xf32>
    %11 = arith.truncf %8 : vector<8x128xf32> to vector<8x128xbf16>
    %cst_10 = arith.constant dense<0.000000e+00> : vector<8x128xf32>
    %12 = tpu.matmul %11, %9, %cst_10 {dimension_numbers = #tpu.dot_dimension_numbers<[1], [0], [0], [1], [0, 0, 1, 1], [], []>} : vector<8x128xbf16>, vector<128x128xbf16>, vector<8x128xf32> -> vector<8x128xf32>
    %13 = vector.broadcast %10 : vector<1x128xf32> to vector<8x128xf32>
    %14 = arith.addf %12, %13 : vector<8x128xf32>
    %cst_11 = arith.constant 0.000000e+00 : f32
    %15 = vector.broadcast %cst_11 : f32 to vector<8x128xf32>
    %16 = arith.maximumf %14, %15 : vector<8x128xf32>
    %c0_12 = arith.constant 0 : index
    %c0_13 = arith.constant 0 : index
    %17 = vector.load %arg6[%c0_12, %c0_13] : memref<128x128xbf16, #tpu.memory_space<vmem>>, vector<128x128xbf16>
    %c0_14 = arith.constant 0 : index
    %c0_15 = arith.constant 0 : index
    %18 = vector.load %arg7[%c0_14, %c0_15] : memref<1x128xf32, #tpu.memory_space<vmem>>, vector<1x128xf32>
    %19 = arith.truncf %16 : vector<8x128xf32> to vector<8x128xbf16>
    %cst_16 = arith.constant dense<0.000000e+00> : vector<8x128xf32>
    %20 = tpu.matmul %19, %17, %cst_16 {dimension_numbers = #tpu.dot_dimension_numbers<[1], [0], [0], [1], [0, 0, 1, 1], [], []>} : vector<8x128xbf16>, vector<128x128xbf16>, vector<8x128xf32> -> vector<8x128xf32>
    %21 = vector.broadcast %18 : vector<1x128xf32> to vector<8x128xf32>
    %22 = arith.addf %20, %21 : vector<8x128xf32>
    %cst_17 = arith.constant 0.000000e+00 : f32
    %23 = vector.broadcast %cst_17 : f32 to vector<8x128xf32>
    %24 = arith.maximumf %22, %23 : vector<8x128xf32>
    %c0_18 = arith.constant 0 : index
    %c0_19 = arith.constant 0 : index
    %25 = vector.load %arg8[%c0_18, %c0_19] : memref<128x128xbf16, #tpu.memory_space<vmem>>, vector<128x128xbf16>
    %c0_20 = arith.constant 0 : index
    %c0_21 = arith.constant 0 : index
    %26 = vector.load %arg9[%c0_20, %c0_21] : memref<1x128xf32, #tpu.memory_space<vmem>>, vector<1x128xf32>
    %27 = arith.truncf %24 : vector<8x128xf32> to vector<8x128xbf16>
    %cst_22 = arith.constant dense<0.000000e+00> : vector<8x128xf32>
    %28 = tpu.matmul %27, %25, %cst_22 {dimension_numbers = #tpu.dot_dimension_numbers<[1], [0], [0], [1], [0, 0, 1, 1], [], []>} : vector<8x128xbf16>, vector<128x128xbf16>, vector<8x128xf32> -> vector<8x128xf32>
    %29 = vector.broadcast %26 : vector<1x128xf32> to vector<8x128xf32>
    %30 = arith.addf %28, %29 : vector<8x128xf32>
    %c0_23 = arith.constant 0 : index
    %c0_24 = arith.constant 0 : index
    %31 = vector.load %arg10[%c0_23, %c0_24] : memref<8x128xf32, #tpu.memory_space<vmem>>, vector<8x128xf32>
    tpu.vector_store %arg10[%c0_23, %c0_24], %30 {strides = array<i32>} : memref<8x128xf32, #tpu.memory_space<vmem>>, vector<8x128xf32>,
    return
  }
  func.func @transform_0(%arg0: i32) -> (i32, i32) {
    %c0_i32 = arith.constant 0 : i32
    %c0_i32_0 = arith.constant 0 : i32
    return %arg0, %c0_i32 : i32, i32
  }
  func.func @transform_1(%arg0: i32) -> (i32, i32) {
    %c0_i32 = arith.constant 0 : i32
    %c0_i32_0 = arith.constant 0 : i32
    %c0_i32_1 = arith.constant 0 : i32
    return %c0_i32, %c0_i32_0 : i32, i32
  }
  func.func @transform_2(%arg0: i32) -> (i32, i32) {
    %c0_i32 = arith.constant 0 : i32
    %c0_i32_0 = arith.constant 0 : i32
    %c0_i32_1 = arith.constant 0 : i32
    return %c0_i32, %c0_i32_0 : i32, i32
  }
  func.func @transform_3(%arg0: i32) -> (i32, i32) {
    %c0_i32 = arith.constant 0 : i32
    %c0_i32_0 = arith.constant 0 : i32
    %c0_i32_1 = arith.constant 0 : i32
    return %c0_i32, %c0_i32_0 : i32, i32
  }
  func.func @transform_4(%arg0: i32) -> (i32, i32) {
    %c0_i32 = arith.constant 0 : i32
    %c0_i32_0 = arith.constant 0 : i32
    %c0_i32_1 = arith.constant 0 : i32
    return %c0_i32, %c0_i32_0 : i32, i32
  }
  func.func @transform_5(%arg0: i32) -> (i32, i32) {
    %c0_i32 = arith.constant 0 : i32
    %c0_i32_0 = arith.constant 0 : i32
    %c0_i32_1 = arith.constant 0 : i32
    return %c0_i32, %c0_i32_0 : i32, i32
  }
  func.func @transform_6(%arg0: i32) -> (i32, i32) {
    %c0_i32 = arith.constant 0 : i32
    %c0_i32_0 = arith.constant 0 : i32
    %c0_i32_1 = arith.constant 0 : i32
    return %c0_i32, %c0_i32_0 : i32, i32
  }
  func.func @transform_7(%arg0: i32) -> (i32, i32) {
    %c0_i32 = arith.constant 0 : i32
    %c0_i32_0 = arith.constant 0 : i32
    %c0_i32_1 = arith.constant 0 : i32
    return %c0_i32, %c0_i32_0 : i32, i32
  }
  func.func @transform_8(%arg0: i32) -> (i32, i32) {
    %c0_i32 = arith.constant 0 : i32
    %c0_i32_0 = arith.constant 0 : i32
    %c0_i32_1 = arith.constant 0 : i32
    return %c0_i32, %c0_i32_0 : i32, i32
  }
  func.func @transform_9(%arg0: i32) -> (i32, i32) {
    %c0_i32 = arith.constant 0 : i32
    %c0_i32_0 = arith.constant 0 : i32
    return %arg0, %c0_i32 : i32, i32
  }
}

</mosaic_0001>

<bundles_post_ra>
// kernel: tpu_custom_call.1
= control target key start
LH: loop header
LB: loop body
LE: loop exit
PB: predicated region body
PF: predicated region fallthrough
CT: control target
= control target key end

     0   :  { %14 = vsyncpa [#allocation3], 0  ;;  %s801_s0 = inlined_call_operand.hbm [shape: f32[8,32], index: 0, kind: input, shape index: {}]   ;;  %s802_s1 = inlined_call_operand.hbm [shape: bf16[32,128], index: 1, kind: input, shape index: {}]   ;;  %s803_s2 = inlined_call_operand.vmem [shape: f32[1,128], index: 2, kind: input, shape index: {}]   ;;  %s804_s3 = inlined_call_operand.hbm [shape: bf16[128,128], index: 3, kind: input, shape index: {}]   ;;  %s805_s4 = inlined_call_operand.vmem [shape: f32[1,128], index: 4, kind: input, shape index: {}]   ;;  %s806_s5 = inlined_call_operand.hbm [shape: bf16[128,128], index: 5, kind: input, shape index: {}]   ;;  %s807_s6 = inlined_call_operand.vmem [shape: f32[1,128], index: 6, kind: input, shape index: {}]   ;;  %s808_s7 = inlined_call_operand.hbm [shape: bf16[128,128], index: 7, kind: input, shape index: {}]   ;;  %s809_s8 = inlined_call_operand.vmem [shape: f32[1,128], index: 8, kind: input, shape index: {}]   ;;  %s810_s9 = inlined_call_operand.hbm [shape: f32[8,128], index: 9, kind: output, shape index: {}]  }
   0x1   :  { %15 = vsyncpa [#allocation6], 0 }
   0x2   :  { %16 = vsyncpa [#allocation9], 0  ;;  %s33_s11 = sshll.u32 %s802_s1, 4  ;;  %s34_s11 = int_to_ptr.hbm [resolvable:$true] %s33_s11 }
   0x3   :  { %17 = vsyncpa [#allocation4], 0  ;;  %s713_s12 = smov [#allocation5]   ;;  %s63_s16 = sshll.u32 %s806_s5, 4  ;;  %s64_s16 = int_to_ptr.hbm [resolvable:$true] %s63_s16 }
   0x4   :  { %s35_s13 = sshll.u32 %s713_s12, 4  ;;  %s714_s17 = smov 64   ;;  %s36_s13 = int_to_ptr.vmem [resolvable:$true] %s35_s13 }
   0x5   :  { %s715_s18 = smov 4   ;;  %s716_s19 = smov [#allocation8]  }
   0x6   :  { %41 = dma.hbm_to_vmem [thread:$0]  %s34_s11, 256, %s36_s13, [#allocation6], %s714_s17, %s714_s17, %s715_s18  }
   0x7   :  { %s65_s20 = sshll.u32 %s716_s19, 4  ;;  %s23_s23 = sshll.u32 %s801_s0, 4  ;;  %s66_s20 = int_to_ptr.vmem [resolvable:$true] %s65_s20  ;;  %s24_s23 = int_to_ptr.hbm [resolvable:$true] %s23_s23 }
   0x8   :  { %71 = dma.hbm_to_vmem [thread:$0]  %s64_s16, 1024, %s66_s20, [#allocation9], %s714_s17, %s714_s17, %s715_s18  }
   0x9   :  { %s48_s25 = sshll.u32 %s804_s3, 4  ;;  %s717_s26 = smov [#allocation2]   ;;  %s49_s25 = int_to_ptr.hbm [resolvable:$true] %s48_s25 }
   0xa   :  { %s25_s27 = sshll.u32 %s717_s26, 4  ;;  %s718_s5 = smov [#allocation7]   ;;  %s26_s27 = int_to_ptr.vmem [resolvable:$true] %s25_s27 }
   0xb   :  { %28 = dma.hbm_to_vmem [thread:$0]  %s24_s23, 128, %s26_s27, [#allocation3]  }
   0xc   :  { %s50_s28 = sshll.u32 %s718_s5, 4  ;;  %s78_s10 = sshll.u32 %s808_s7, 4  ;;  %s51_s28 = int_to_ptr.vmem [resolvable:$true] %s50_s28  ;;  %s79_s10 = int_to_ptr.hbm [resolvable:$true] %s78_s10 }
   0xd   :  { %56 = dma.hbm_to_vmem [thread:$0]  %s49_s25, 1024, %s51_s28, [#allocation6], %s714_s17, %s714_s17, %s715_s18  }
   0xe   :  { %s719_s0 = smov [#allocation10]  }
   0xf   :  { %s80_s11 = sshll.u32 %s719_s0, 4  ;;  %s81_s11 = int_to_ptr.vmem [resolvable:$true] %s80_s11 }
  0x10   :  { %86 = dma.hbm_to_vmem [thread:$0]  %s79_s10, 1024, %s81_s11, [#allocation9], %s714_s17, %s714_s17, %s715_s18  }
  0x11   :  { %705 = dma.done.wait [#allocation3], 128  }
  0x12   :  { %706 = vsyncadd [#allocation3], 4294967168 }
  0x13   :  { %707 = dma.done.wait [#allocation6], 1280  }
  0x14   :  { %708 = vsyncadd [#allocation6], 4294966016 }
  0x15   :  { %709 = dma.done.wait [#allocation9], 2048  }
  0x16   :  { %710 = vsyncadd [#allocation9], 4294965248  ;;  %v524_v0 = vld [vmem:[#allocation5 + $0x8] sm:$0xff]  ;;  %v523_v2 = vld [vmem:[#allocation5] sm:$0xff]  ;;  %vm132_vm0 = vcmask 261120   ;;  %s720_s16 = smov [#allocation11]  }
  0x17   :  { %v532_v1 = vld [vmem:[#allocation7 + $0x38] sm:$0xff]  ;;  %142 = vmatpush.bf16.msra.mxu0 %v524_v0  ;;  %v110_v3 = vld [vmem:[#allocation2] sm:$0xff]  ;;  %v531_v4 = vld [vmem:[#allocation7 + $0x30] sm:$0xff]  ;;  %s404_s17 = sshll.u32 %s720_s16, 4  ;;  %s406_s20 = sshll.u32 %s810_s9, 4  ;;  %s405_s17 = int_to_ptr.vmem [resolvable:$true] %s404_s17  ;;  %s407_s20 = int_to_ptr.hbm [resolvable:$true] %s406_s20 }
  0x18   :  { %219 = vmatpush.bf16.msra.mxu1 %v532_v1  ;;  %v116_v5 = vpack.c.bf16 %v110_v3, %v110_v3  ;;  %v530_v6 = vld [vmem:[#allocation7 + $0x28] sm:$0xff]  ;;  %v529_v7 = vld [vmem:[#allocation7 + $0x20] sm:$0xff]  ;;  %v528_v8 = vld [vmem:[#allocation7 + $0x18] sm:$0xff] }
  0x19   :  { %v527_v9 = vld [vmem:[#allocation7 + $0x10] sm:$0xff]  ;;  %v526_v10 = vld [vmem:[#allocation7 + $0x8] sm:$0xff]  ;;  %v525_v11 = vld [vmem:[#allocation7] sm:$0xff] }
  0x1a   :  { %v540_v12 = vld [vmem:[#allocation8 + $0x38] sm:$0xff]  ;;  %v539_v13 = vld [vmem:[#allocation8 + $0x30] sm:$0xff]  ;;  %v538_v14 = vld [vmem:[#allocation8 + $0x28] sm:$0xff] }
  0x1b   :  { %143 = vmatpush.bf16.msra.mxu0 %v523_v2  ;;  %302 = vmatpush.bf16.msra.mxu2 %v540_v12  ;;  %v537_v15 = vld [vmem:[#allocation8 + $0x20] sm:$0xff]  ;;  %v536_v16 = vld [vmem:[#allocation8 + $0x18] sm:$0xff]  ;;  %v535_v17 = vld [vmem:[#allocation8 + $0x10] sm:$0xff] }
  0x1c   :  { %220 = vmatpush.bf16.msra.mxu1 %v531_v4  ;;  %v557_v18 = vld [vmem:[%s803_s2] ss:$0 sm:$0xff]  ;;  %v533_v25 = vld [vmem:[#allocation8] sm:$0xff]  ;;  %v548_v26 = vld [vmem:[#allocation10 + $0x38] sm:$0xff] }
  0x1d   :  { %v534_v24 = vld [vmem:[#allocation8 + $0x8] sm:$0xff]  ;;  %385 = vmatpush.bf16.msra.mxu3 %v548_v26  ;;  %v547_v27 = vld [vmem:[#allocation10 + $0x30] sm:$0xff]  ;;  %v545_v29 = vld [vmem:[#allocation10 + $0x20] sm:$0xff] }
  0x1e   :  { %426 = vmatmul.msk.bf16.vlgmr.msra.gmra.mxu0 %vm132_vm0, %v116_v5  ;;  %v546_v28 = vld [vmem:[#allocation10 + $0x28] sm:$0xff]  ;;  %v544_v30 = vld [vmem:[#allocation10 + $0x18] sm:$0xff]  ;;  %v543_v31 = vld [vmem:[#allocation10 + $0x10] sm:$0xff] }
  0x1f   :  { %303 = vmatpush.bf16.msra.mxu2 %v539_v13  ;;  %v558_v32 = vld [vmem:[%s805_s4] ss:$0 sm:$0xff]  ;;  %v541_v39 = vld [vmem:[#allocation10] sm:$0xff] }
  0x20   :  { %221 = vmatpush.bf16.msra.mxu1 %v530_v6  ;;  %v542_v38 = vld [vmem:[#allocation10 + $0x8] sm:$0xff] }
  0x21   :  { %386 = vmatpush.bf16.msra.mxu3 %v547_v27  ;;  %v559_v40 = vld [vmem:[%s807_s6] ss:$0 sm:$0xff] }
  0x22   :  { %v560_v46 = vld [vmem:[%s809_s8] ss:$0 sm:$0xff] }
  0x23   :  { %304 = vmatpush.bf16.msra.mxu2 %v538_v14 }
  0x24   :  { %222 = vmatpush.bf16.msra.mxu1 %v529_v7 }
  0x25   :  { %387 = vmatpush.bf16.msra.mxu3 %v546_v28 }
  0x27   :  { %305 = vmatpush.bf16.msra.mxu2 %v537_v15 }
  0x28   :  { %223 = vmatpush.bf16.msra.mxu1 %v528_v8 }
  0x29   :  { %388 = vmatpush.bf16.msra.mxu3 %v545_v29 }
  0x2b   :  { %306 = vmatpush.bf16.msra.mxu2 %v536_v16 }
  0x2c   :  { %224 = vmatpush.bf16.msra.mxu1 %v527_v9 }
  0x2d   :  { %389 = vmatpush.bf16.msra.mxu3 %v544_v30 }
  0x2f   :  { %307 = vmatpush.bf16.msra.mxu2 %v535_v17 }
  0x30   :  { %225 = vmatpush.bf16.msra.mxu1 %v526_v10 }
  0x31   :  { %390 = vmatpush.bf16.msra.mxu3 %v543_v31 }
  0x33   :  { %308 = vmatpush.bf16.msra.mxu2 %v534_v24 }
  0x34   :  { %226 = vmatpush.bf16.msra.mxu1 %v525_v11 }
  0x35   :  { %391 = vmatpush.bf16.msra.mxu3 %v542_v38 }
  0x37   :  { %309 = vmatpush.bf16.msra.mxu2 %v533_v25 }
  0x39   :  { %392 = vmatpush.bf16.msra.mxu3 %v541_v39 }
  0x9b   :  { %v145_v19 = vpop.f32.mrf.mxu0 }
  0x9c   :  { %v146_v20 = vadd.f32 %v557_v18, %v145_v19 }
  0x9e   :  { %v149_v21 = vmax.f32 %v146_v20, 0.0 }
  0xa0   :  { %v167_v22 = vpack.c.bf16 %v149_v21, %v149_v21 }
  0xa2   :  { %227 = vmatmul.bf16.vlgmr.msra.gmra.mxu1 %v167_v22 }
  0xa3   :  { %v147_v23 = vpop.f32.mrf.mxu0 }
 0x11f   :  { %v228_v33 = vpop.f32.mrf.mxu1 }
 0x120   :  { %v229_v34 = vadd.f32 %v558_v32, %v228_v33 }
 0x122   :  { %v232_v35 = vmax.f32 %v229_v34, 0.0 }
 0x124   :  { %v250_v36 = vpack.c.bf16 %v232_v35, %v232_v35 }
 0x126   :  { %310 = vmatmul.bf16.vlgmr.msra.gmra.mxu2 %v250_v36 }
 0x127   :  { %v230_v37 = vpop.f32.mrf.mxu1 }
 0x1a9   :  { %v311_v41 = vpop.f32.mrf.mxu2 }
 0x1aa   :  { %v312_v42 = vadd.f32 %v559_v40, %v311_v41 }
 0x1ac   :  { %v315_v43 = vmax.f32 %v312_v42, 0.0 }
 0x1ae   :  { %v333_v44 = vpack.c.bf16 %v315_v43, %v315_v43 }
 0x1b0   :  { %393 = vmatmul.bf16.vlgmr.msra.gmra.mxu3 %v333_v44 }
 0x1b1   :  { %v313_v45 = vpop.f32.mrf.mxu2 }
 0x233   :  { %v394_v47 = vpop.f32.mrf.mxu3 }
 0x234   :  { %v395_v48 = vadd.f32 %v560_v46, %v394_v47 }
 0x236   :  { %398 = vst [vmem:[#allocation11] sm:$0xff] %v395_v48 }
 0x237   :  { %409 = dma.vmem_to_hbm [thread:$0]  %s405_s17, 128, %s407_s20, [#allocation4]  }
 0x23b   :  { %v396_v49 = vpop.f32.mrf.mxu3 }
 0x23c   :  { %711 = dma.done.wait [#allocation4], 128  }
 0x23d   :  { %712 = vsyncadd [#allocation4], 4294967168 }
 0x23e   :  { %414 = vsyncpa [#allocation3], 1 }
 0x23f   :  { %415 = vsyncpa [#allocation6], 1 }
 0x240   :  { %416 = vsyncpa [#allocation9], 1 }
 0x241   :  { %417 = vsyncpa [#allocation4], 1 }

// kernel: tpu_custom_call.1
= control target key start
LH: loop header
LB: loop body
LE: loop exit
PB: predicated region body
PF: predicated region fallthrough
CT: control target
= control target key end

     0   :  { %14 = vsyncpa [#allocation3], 0  ;;  %s801_s0 = inlined_call_operand.hbm [shape: f32[8,32], index: 0, kind: input, shape index: {}]   ;;  %s802_s1 = inlined_call_operand.hbm [shape: bf16[32,128], index: 1, kind: input, shape index: {}]   ;;  %s803_s2 = inlined_call_operand.vmem [shape: f32[1,128], index: 2, kind: input, shape index: {}]   ;;  %s804_s3 = inlined_call_operand.hbm [shape: bf16[128,128], index: 3, kind: input, shape index: {}]   ;;  %s805_s4 = inlined_call_operand.vmem [shape: f32[1,128], index: 4, kind: input, shape index: {}]   ;;  %s806_s5 = inlined_call_operand.hbm [shape: bf16[128,128], index: 5, kind: input, shape index: {}]   ;;  %s807_s6 = inlined_call_operand.vmem [shape: f32[1,128], index: 6, kind: input, shape index: {}]   ;;  %s808_s7 = inlined_call_operand.hbm [shape: bf16[128,128], index: 7, kind: input, shape index: {}]   ;;  %s809_s8 = inlined_call_operand.vmem [shape: f32[1,128], index: 8, kind: input, shape index: {}]   ;;  %s810_s9 = inlined_call_operand.hbm [shape: f32[8,128], index: 9, kind: output, shape index: {}]  }
   0x1   :  { %15 = vsyncpa [#allocation6], 0 }
   0x2   :  { %16 = vsyncpa [#allocation9], 0  ;;  %s33_s11 = sshll.u32 %s802_s1, 4  ;;  %s34_s11 = int_to_ptr.hbm [resolvable:$true] %s33_s11 }
   0x3   :  { %17 = vsyncpa [#allocation4], 0  ;;  %s713_s12 = smov [#allocation5]   ;;  %s63_s16 = sshll.u32 %s806_s5, 4  ;;  %s64_s16 = int_to_ptr.hbm [resolvable:$true] %s63_s16 }
   0x4   :  { %s35_s13 = sshll.u32 %s713_s12, 4  ;;  %s714_s17 = smov 64   ;;  %s36_s13 = int_to_ptr.vmem [resolvable:$true] %s35_s13 }
   0x5   :  { %s715_s18 = smov 4   ;;  %s716_s19 = smov [#allocation8]  }
   0x6   :  { %41 = dma.hbm_to_vmem [thread:$0]  %s34_s11, 256, %s36_s13, [#allocation6], %s714_s17, %s714_s17, %s715_s18  }
   0x7   :  { %s65_s20 = sshll.u32 %s716_s19, 4  ;;  %s23_s23 = sshll.u32 %s801_s0, 4  ;;  %s66_s20 = int_to_ptr.vmem [resolvable:$true] %s65_s20  ;;  %s24_s23 = int_to_ptr.hbm [resolvable:$true] %s23_s23 }
   0x8   :  { %71 = dma.hbm_to_vmem [thread:$0]  %s64_s16, 1024, %s66_s20, [#allocation9], %s714_s17, %s714_s17, %s715_s18  }
   0x9   :  { %s48_s25 = sshll.u32 %s804_s3, 4  ;;  %s717_s26 = smov [#allocation2]   ;;  %s49_s25 = int_to_ptr.hbm [resolvable:$true] %s48_s25 }
   0xa   :  { %s25_s27 = sshll.u32 %s717_s26, 4  ;;  %s718_s5 = smov [#allocation7]   ;;  %s26_s27 = int_to_ptr.vmem [resolvable:$true] %s25_s27 }
   0xb   :  { %28 = dma.hbm_to_vmem [thread:$0]  %s24_s23, 128, %s26_s27, [#allocation3]  }
   0xc   :  { %s50_s28 = sshll.u32 %s718_s5, 4  ;;  %s78_s10 = sshll.u32 %s808_s7, 4  ;;  %s51_s28 = int_to_ptr.vmem [resolvable:$true] %s50_s28  ;;  %s79_s10 = int_to_ptr.hbm [resolvable:$true] %s78_s10 }
   0xd   :  { %56 = dma.hbm_to_vmem [thread:$0]  %s49_s25, 1024, %s51_s28, [#allocation6], %s714_s17, %s714_s17, %s715_s18  }
   0xe   :  { %s719_s0 = smov [#allocation10]  }
   0xf   :  { %s80_s11 = sshll.u32 %s719_s0, 4  ;;  %s81_s11 = int_to_ptr.vmem [resolvable:$true] %s80_s11 }
  0x10   :  { %86 = dma.hbm_to_vmem [thread:$0]  %s79_s10, 1024, %s81_s11, [#allocation9], %s714_s17, %s714_s17, %s715_s18  }
  0x11   :  { %705 = dma.done.wait [#allocation3], 128  }
  0x12   :  { %706 = vsyncadd [#allocation3], 4294967168 }
  0x13   :  { %707 = dma.done.wait [#allocation6], 1280  }
  0x14   :  { %708 = vsyncadd [#allocation6], 4294966016 }
  0x15   :  { %709 = dma.done.wait [#allocation9], 2048  }
  0x16   :  { %710 = vsyncadd [#allocation9], 4294965248  ;;  %v524_v0 = vld [vmem:[#allocation5 + $0x8] sm:$0xff]  ;;  %v523_v2 = vld [vmem:[#allocation5] sm:$0xff]  ;;  %vm132_vm0 = vcmask 261120   ;;  %s720_s16 = smov [#allocation11]  }
  0x17   :  { %v532_v1 = vld [vmem:[#allocation7 + $0x38] sm:$0xff]  ;;  %142 = vmatpush.bf16.msra.mxu0 %v524_v0  ;;  %v110_v3 = vld [vmem:[#allocation2] sm:$0xff]  ;;  %v531_v4 = vld [vmem:[#allocation7 + $0x30] sm:$0xff]  ;;  %s404_s17 = sshll.u32 %s720_s16, 4  ;;  %s406_s20 = sshll.u32 %s810_s9, 4  ;;  %s405_s17 = int_to_ptr.vmem [resolvable:$true] %s404_s17  ;;  %s407_s20 = int_to_ptr.hbm [resolvable:$true] %s406_s20 }
  0x18   :  { %219 = vmatpush.bf16.msra.mxu1 %v532_v1  ;;  %v116_v5 = vpack.c.bf16 %v110_v3, %v110_v3  ;;  %v530_v6 = vld [vmem:[#allocation7 + $0x28] sm:$0xff]  ;;  %v529_v7 = vld [vmem:[#allocation7 + $0x20] sm:$0xff]  ;;  %v528_v8 = vld [vmem:[#allocation7 + $0x18] sm:$0xff] }
  0x19   :  { %v527_v9 = vld [vmem:[#allocation7 + $0x10] sm:$0xff]  ;;  %v526_v10 = vld [vmem:[#allocation7 + $0x8] sm:$0xff]  ;;  %v525_v11 = vld [vmem:[#allocation7] sm:$0xff] }
  0x1a   :  { %v540_v12 = vld [vmem:[#allocation8 + $0x38] sm:$0xff]  ;;  %v539_v13 = vld [vmem:[#allocation8 + $0x30] sm:$0xff]  ;;  %v538_v14 = vld [vmem:[#allocation8 + $0x28] sm:$0xff] }
  0x1b   :  { %143 = vmatpush.bf16.msra.mxu0 %v523_v2  ;;  %302 = vmatpush.bf16.msra.mxu2 %v540_v12  ;;  %v537_v15 = vld [vmem:[#allocation8 + $0x20] sm:$0xff]  ;;  %v536_v16 = vld [vmem:[#allocation8 + $0x18] sm:$0xff]  ;;  %v535_v17 = vld [vmem:[#allocation8 + $0x10] sm:$0xff] }
  0x1c   :  { %220 = vmatpush.bf16.msra.mxu1 %v531_v4  ;;  %v557_v18 = vld [vmem:[%s803_s2] ss:$0 sm:$0xff]  ;;  %v533_v25 = vld [vmem:[#allocation8] sm:$0xff]  ;;  %v548_v26 = vld [vmem:[#allocation10 + $0x38] sm:$0xff] }
  0x1d   :  { %v534_v24 = vld [vmem:[#allocation8 + $0x8] sm:$0xff]  ;;  %385 = vmatpush.bf16.msra.mxu3 %v548_v26  ;;  %v547_v27 = vld [vmem:[#allocation10 + $0x30] sm:$0xff]  ;;  %v545_v29 = vld [vmem:[#allocation10 + $0x20] sm:$0xff] }
  0x1e   :  { %426 = vmatmul.msk.bf16.vlgmr.msra.gmra.mxu0 %vm132_vm0, %v116_v5  ;;  %v546_v28 = vld [vmem:[#allocation10 + $0x28] sm:$0xff]  ;;  %v544_v30 = vld [vmem:[#allocation10 + $0x18] sm:$0xff]  ;;  %v543_v31 = vld [vmem:[#allocation10 + $0x10] sm:$0xff] }
  0x1f   :  { %303 = vmatpush.bf16.msra.mxu2 %v539_v13  ;;  %v558_v32 = vld [vmem:[%s805_s4] ss:$0 sm:$0xff]  ;;  %v541_v39 = vld [vmem:[#allocation10] sm:$0xff] }
  0x20   :  { %221 = vmatpush.bf16.msra.mxu1 %v530_v6  ;;  %v542_v38 = vld [vmem:[#allocation10 + $0x8] sm:$0xff] }
  0x21   :  { %386 = vmatpush.bf16.msra.mxu3 %v547_v27  ;;  %v559_v40 = vld [vmem:[%s807_s6] ss:$0 sm:$0xff] }
  0x22   :  { %v560_v46 = vld [vmem:[%s809_s8] ss:$0 sm:$0xff] }
  0x23   :  { %304 = vmatpush.bf16.msra.mxu2 %v538_v14 }
  0x24   :  { %222 = vmatpush.bf16.msra.mxu1 %v529_v7 }
  0x25   :  { %387 = vmatpush.bf16.msra.mxu3 %v546_v28 }
  0x27   :  { %305 = vmatpush.bf16.msra.mxu2 %v537_v15 }
  0x28   :  { %223 = vmatpush.bf16.msra.mxu1 %v528_v8 }
  0x29   :  { %388 = vmatpush.bf16.msra.mxu3 %v545_v29 }
  0x2b   :  { %306 = vmatpush.bf16.msra.mxu2 %v536_v16 }
  0x2c   :  { %224 = vmatpush.bf16.msra.mxu1 %v527_v9 }
  0x2d   :  { %389 = vmatpush.bf16.msra.mxu3 %v544_v30 }
  0x2f   :  { %307 = vmatpush.bf16.msra.mxu2 %v535_v17 }
  0x30   :  { %225 = vmatpush.bf16.msra.mxu1 %v526_v10 }
  0x31   :  { %390 = vmatpush.bf16.msra.mxu3 %v543_v31 }
  0x33   :  { %308 = vmatpush.bf16.msra.mxu2 %v534_v24 }
  0x34   :  { %226 = vmatpush.bf16.msra.mxu1 %v525_v11 }
  0x35   :  { %391 = vmatpush.bf16.msra.mxu3 %v542_v38 }
  0x37   :  { %309 = vmatpush.bf16.msra.mxu2 %v533_v25 }
  0x39   :  { %392 = vmatpush.bf16.msra.mxu3 %v541_v39 }
  0x9b   :  { %v145_v19 = vpop.f32.mrf.mxu0 }
  0x9c   :  { %v146_v20 = vadd.f32 %v557_v18, %v145_v19 }
  0x9e   :  { %v149_v21 = vmax.f32 %v146_v20, 0.0 }
  0xa0   :  { %v167_v22 = vpack.c.bf16 %v149_v21, %v149_v21 }
  0xa2   :  { %227 = vmatmul.bf16.vlgmr.msra.gmra.mxu1 %v167_v22 }
  0xa3   :  { %v147_v23 = vpop.f32.mrf.mxu0 }
 0x11f   :  { %v228_v33 = vpop.f32.mrf.mxu1 }
 0x120   :  { %v229_v34 = vadd.f32 %v558_v32, %v228_v33 }
 0x122   :  { %v232_v35 = vmax.f32 %v229_v34, 0.0 }
 0x124   :  { %v250_v36 = vpack.c.bf16 %v232_v35, %v232_v35 }
 0x126   :  { %310 = vmatmul.bf16.vlgmr.msra.gmra.mxu2 %v250_v36 }
 0x127   :  { %v230_v37 = vpop.f32.mrf.mxu1 }
 0x1a9   :  { %v311_v41 = vpop.f32.mrf.mxu2 }
 0x1aa   :  { %v312_v42 = vadd.f32 %v559_v40, %v311_v41 }
 0x1ac   :  { %v315_v43 = vmax.f32 %v312_v42, 0.0 }
 0x1ae   :  { %v333_v44 = vpack.c.bf16 %v315_v43, %v315_v43 }
 0x1b0   :  { %393 = vmatmul.bf16.vlgmr.msra.gmra.mxu3 %v333_v44 }
 0x1b1   :  { %v313_v45 = vpop.f32.mrf.mxu2 }
 0x233   :  { %v394_v47 = vpop.f32.mrf.mxu3 }
 0x234   :  { %v395_v48 = vadd.f32 %v560_v46, %v394_v47 }
 0x236   :  { %398 = vst [vmem:[#allocation11] sm:$0xff] %v395_v48 }
 0x237   :  { %409 = dma.vmem_to_hbm [thread:$0]  %s405_s17, 128, %s407_s20, [#allocation4]  }
 0x23b   :  { %v396_v49 = vpop.f32.mrf.mxu3 }
 0x23c   :  { %711 = dma.done.wait [#allocation4], 128  }
 0x23d   :  { %712 = vsyncadd [#allocation4], 4294967168 }
 0x23e   :  { %414 = vsyncpa [#allocation3], 1 }
 0x23f   :  { %415 = vsyncpa [#allocation6], 1 }
 0x240   :  { %416 = vsyncpa [#allocation9], 1 }
 0x241   :  { %417 = vsyncpa [#allocation4], 1 }

</bundles_post_ra>
